<compile_context>
chip_gen: v7x
topology: tpu7x:2x2x1
jax: 0.10.0
libtpu: 0.0.40
codegen_flags: <defaults>
</compile_context>

<pallas_src>
import functools

import jax
import jax.numpy as jnp
from jax.experimental import pallas as pl
from jax.experimental.pallas import tpu as pltpu

LATENT_DIMS = 10
# Layer widths traversed by the forward pass (encoder then decoder).
DIMS = [28 * 28, 128, 64, 12, LATENT_DIMS, 12, 64, 128, 28 * 28]
N_LAYERS = len(DIMS) - 1  # 8 linear layers total


def _round_up(x, m):
    return ((x + m - 1) // m) * m


def autoencoder_kernel(x_ref, *refs):
    """Full forward pass for one batch tile.

    refs = (w0..w7, b0..b7, o_ref). Weights/biases are whole-array blocks with
    constant index maps, so they are DMA'd once and stay resident in VMEM
    across grid steps; only the batch dimension is tiled.
    """
    ws = refs[:N_LAYERS]
    bs = refs[N_LAYERS:2 * N_LAYERS]
    o_ref = refs[2 * N_LAYERS]

    h = x_ref[...]  # bf16 tile, fed straight into the first MXU dot
    for i in range(N_LAYERS):
        # bf16 operands -> native MXU throughput; f32 accumulation.
        h = jnp.dot(h.astype(jnp.bfloat16), ws[i][...],
                    preferred_element_type=jnp.float32)
        h = h + bs[i][...]               # f32 bias broadcast over rows (VPU)
        if i < N_LAYERS - 1:
            h = jnp.maximum(h, 0.0)      # ReLU (VPU)
        else:
            # TODO(synk): on v6e/v7x this sigmoid could run in bf16 (EUP bf16
            # path); kept f32 so one kernel stays safe/fast on v5e too.
            h = jax.nn.sigmoid(h)        # final Sigmoid (EUP)
    o_ref[...] = h.astype(o_ref.dtype)   # bf16 store (784 = 6*128+16 tail is
                                         # a masked vst on a non-binding slot)


def make_params(key, dtype=jnp.float32):
    """Deterministic PyTorch-style (uniform +-1/sqrt(fan_in)) init."""
    ws, bs = [], []
    for i in range(N_LAYERS):
        fan_in, fan_out = DIMS[i], DIMS[i + 1]
        key, kw, kb = jax.random.split(key, 3)
        bound = 1.0 / jnp.sqrt(float(fan_in))
        ws.append(jax.random.uniform(kw, (fan_in, fan_out), dtype, -bound, bound))
        bs.append(jax.random.uniform(kb, (1, fan_out), dtype, -bound, bound))
    return ws, bs


@functools.partial(jax.jit, static_argnames=("block_b",))
def autoencoder_forward(x, ws, bs, *, block_b=1024):
    """Forward pass of the autoencoder.

    x: [B, 784]. Returns bf16 [B, 784] (sigmoid outputs; bf16 keeps ~3
    significant digits — cast to f32 downstream if needed).
    block_b: batch-tile cap. Default 1024 suits v5e/v6e (sweep up to 2048
    there) and stays within v7x's 64 MiB VMEM; the tile is additionally
    capped at ceil(B/2) so the grid has >= 2 steps for v7x megacore.
    """
    B, D = x.shape
    assert D == DIMS[0]

    # --- batch tile selection (multiple of 16 for bf16 sublane packing) -----
    bb_user = max(16, (block_b // 16) * 16)      # respect user cap, keep %16==0
    bb_half = _round_up(pl.cdiv(B, 2), 16)       # aim for grid >= 2 (megacore)
    bb = min(bb_user, bb_half)
    Bp = _round_up(B, bb)
    grid = Bp // bb

    # --- inputs: bf16 activations/weights, f32 biases ------------------------
    x_b = x.astype(jnp.bfloat16)
    if Bp != B:  # only pad batch rows when B isn't a whole number of tiles
        x_b = jnp.zeros((Bp, D), jnp.bfloat16).at[:B].set(x_b)
    ws_b = [w.astype(jnp.bfloat16) for w in ws]
    bs_f = [b.astype(jnp.float32) for b in bs]

    # --- specs (weights/biases: whole array, constant index map) -------------
    x_spec = pl.BlockSpec((bb, D), lambda i: (i, 0))
    w_specs = [pl.BlockSpec((DIMS[l], DIMS[l + 1]), lambda i: (0, 0))
               for l in range(N_LAYERS)]
    b_specs = [pl.BlockSpec((1, DIMS[l + 1]), lambda i: (0, 0))
               for l in range(N_LAYERS)]
    out_spec = pl.BlockSpec((bb, D), lambda i: (i, 0))

    # --- advisory cost estimate (bf16 I/O, real 784-wide columns) ------------
    flops = 2 * Bp * sum(DIMS[l] * DIMS[l + 1] for l in range(N_LAYERS))
    transcendentals = Bp * D  # final sigmoid
    bytes_accessed = (Bp * D * 2 * 2                    # bf16 input + output
                      + sum(w.size for w in ws_b) * 2   # bf16 weights
                      + sum(b.size for b in bs_f) * 4)  # f32 biases

    out = pl.pallas_call(
        autoencoder_kernel,
        out_shape=jax.ShapeDtypeStruct((Bp, D), jnp.bfloat16),
        grid_spec=pltpu.PrefetchScalarGridSpec(
            num_scalar_prefetch=0,
            grid=(grid,),
            in_specs=[x_spec] + w_specs + b_specs,
            out_specs=out_spec,
        ),
        compiler_params=pltpu.CompilerParams(
            dimension_semantics=("parallel",),
            vmem_limit_bytes=48 * 1024 * 1024,
        ),
        cost_estimate=pl.CostEstimate(
            flops=flops,
            transcendentals=transcendentals,
            bytes_accessed=bytes_accessed,
        ),
    )(x_b, *ws_b, *bs_f)

    # Strip batch padding only when it was added.
    return out[:B] if Bp != B else out


def reference_forward(x, ws, bs):
    """Pure-JAX f32 reference (matches the PyTorch module)."""
    h = x.astype(jnp.float32)
    for i in range(N_LAYERS):
        h = h @ ws[i] + bs[i]
        h = jnp.maximum(h, 0.0) if i < N_LAYERS - 1 else jax.nn.sigmoid(h)
    return h


if __name__ == "__main__":
    key = jax.random.PRNGKey(0)
    k_params, k_x = jax.random.split(key)

    ws, bs = make_params(k_params)

    # Small demo batch; deliberately NOT a multiple of 16 to exercise the
    # batch-padding path. bb resolves to 16 -> grid of 2 (megacore sharding).
    B = 30
    x = jax.random.uniform(k_x, (B, 28 * 28), jnp.float32)
    ref = reference_forward(x, ws, bs)

    out = jax.block_until_ready(autoencoder_forward(x, ws, bs))
    assert out.shape == (B, 28 * 28) and out.dtype == jnp.bfloat16
    max_err = float(jnp.max(jnp.abs(out.astype(jnp.float32) - ref)))
    # bf16 matmul operands + bf16 output (f32 accumulation): loose tolerance.
    assert max_err < 4e-2, max_err

    # Single-tile / no-padding path (B == bb, grid == 1).
    x2 = x[:16]
    out2 = jax.block_until_ready(autoencoder_forward(x2, ws, bs))
    assert out2.shape == (16, 28 * 28)
    max_err2 = float(jnp.max(jnp.abs(out2.astype(jnp.float32) - ref[:16])))
    assert max_err2 < 4e-2, max_err2

    print("KERNEL_OK")
</pallas_src>

<mosaic_0001>
module attributes {stable_mosaic.version = 11 : i64} {
  func.func @autoencoder_kernel(%arg0: i32, %arg1: memref<16x784xbf16, #tpu.memory_space<vmem>>, %arg2: memref<784x128xbf16, #tpu.memory_space<vmem>>, %arg3: memref<128x64xbf16, #tpu.memory_space<vmem>>, %arg4: memref<64x12xbf16, #tpu.memory_space<vmem>>, %arg5: memref<12x10xbf16, #tpu.memory_space<vmem>>, %arg6: memref<10x12xbf16, #tpu.memory_space<vmem>>, %arg7: memref<12x64xbf16, #tpu.memory_space<vmem>>, %arg8: memref<64x128xbf16, #tpu.memory_space<vmem>>, %arg9: memref<128x784xbf16, #tpu.memory_space<vmem>>, %arg10: memref<1x128xf32, #tpu.memory_space<vmem>>, %arg11: memref<1x64xf32, #tpu.memory_space<vmem>>, %arg12: memref<1x12xf32, #tpu.memory_space<vmem>>, %arg13: memref<1x10xf32, #tpu.memory_space<vmem>>, %arg14: memref<1x12xf32, #tpu.memory_space<vmem>>, %arg15: memref<1x64xf32, #tpu.memory_space<vmem>>, %arg16: memref<1x128xf32, #tpu.memory_space<vmem>>, %arg17: memref<1x784xf32, #tpu.memory_space<vmem>>, %arg18: memref<16x784xbf16, #tpu.memory_space<vmem>>) attributes {dimension_semantics = [#tpu.dimension_semantics<parallel>], iteration_bounds = array<i64: 2>, scalar_prefetch = 0 : i64, scratch_operands = 0 : i64, tpu.core_type = #tpu.core_type<tc>, window_params = [{transform_indices = @transform_0, window_bounds = array<i64: 16, 784>}, {pipeline_mode = #tpu.pipeline_mode<synchronous>, transform_indices = @transform_1, window_bounds = array<i64: 784, 128>}, {pipeline_mode = #tpu.pipeline_mode<synchronous>, transform_indices = @transform_2, window_bounds = array<i64: 128, 64>}, {pipeline_mode = #tpu.pipeline_mode<synchronous>, transform_indices = @transform_3, window_bounds = array<i64: 64, 12>}, {pipeline_mode = #tpu.pipeline_mode<synchronous>, transform_indices = @transform_4, window_bounds = array<i64: 12, 10>}, {pipeline_mode = #tpu.pipeline_mode<synchronous>, transform_indices = @transform_5, window_bounds = array<i64: 10, 12>}, {pipeline_mode = #tpu.pipeline_mode<synchronous>, transform_indices = @transform_6, window_bounds = array<i64: 12, 64>}, {pipeline_mode = #tpu.pipeline_mode<synchronous>, transform_indices = @transform_7, window_bounds = array<i64: 64, 128>}, {pipeline_mode = #tpu.pipeline_mode<synchronous>, transform_indices = @transform_8, window_bounds = array<i64: 128, 784>}, {pipeline_mode = #tpu.pipeline_mode<synchronous>, transform_indices = @transform_9, window_bounds = array<i64: 1, 128>}, {pipeline_mode = #tpu.pipeline_mode<synchronous>, transform_indices = @transform_10, window_bounds = array<i64: 1, 64>}, {pipeline_mode = #tpu.pipeline_mode<synchronous>, transform_indices = @transform_11, window_bounds = array<i64: 1, 12>}, {pipeline_mode = #tpu.pipeline_mode<synchronous>, transform_indices = @transform_12, window_bounds = array<i64: 1, 10>}, {pipeline_mode = #tpu.pipeline_mode<synchronous>, transform_indices = @transform_13, window_bounds = array<i64: 1, 12>}, {pipeline_mode = #tpu.pipeline_mode<synchronous>, transform_indices = @transform_14, window_bounds = array<i64: 1, 64>}, {pipeline_mode = #tpu.pipeline_mode<synchronous>, transform_indices = @transform_15, window_bounds = array<i64: 1, 128>}, {pipeline_mode = #tpu.pipeline_mode<synchronous>, transform_indices = @transform_16, window_bounds = array<i64: 1, 784>}, {transform_indices = @transform_17, window_bounds = array<i64: 16, 784>}]} {
    %c0 = arith.constant 0 : index
    %c0_0 = arith.constant 0 : index
    %0 = vector.load %arg1[%c0, %c0_0] : memref<16x784xbf16, #tpu.memory_space<vmem>>, vector<16x784xbf16>
    %c0_1 = arith.constant 0 : index
    %c0_2 = arith.constant 0 : index
    %1 = vector.load %arg2[%c0_1, %c0_2] : memref<784x128xbf16, #tpu.memory_space<vmem>>, vector<784x128xbf16>
    %cst = arith.constant dense<0.000000e+00> : vector<16x128xf32>
    %2 = tpu.matmul %0, %1, %cst {dimension_numbers = #tpu.dot_dimension_numbers<[1], [0], [0], [1], [0, 0, 1, 1], [], []>} : vector<16x784xbf16>, vector<784x128xbf16>, vector<16x128xf32> -> vector<16x128xf32>
    %c0_3 = arith.constant 0 : index
    %c0_4 = arith.constant 0 : index
    %3 = vector.load %arg10[%c0_3, %c0_4] : memref<1x128xf32, #tpu.memory_space<vmem>>, vector<1x128xf32>
    %4 = vector.broadcast %3 : vector<1x128xf32> to vector<16x128xf32>
    %5 = arith.addf %2, %4 : vector<16x128xf32>
    %cst_5 = arith.constant 0.000000e+00 : f32
    %6 = vector.broadcast %cst_5 : f32 to vector<16x128xf32>
    %7 = arith.maximumf %5, %6 : vector<16x128xf32>
    %8 = arith.truncf %7 : vector<16x128xf32> to vector<16x128xbf16>
    %c0_6 = arith.constant 0 : index
    %c0_7 = arith.constant 0 : index
    %9 = vector.load %arg3[%c0_6, %c0_7] : memref<128x64xbf16, #tpu.memory_space<vmem>>, vector<128x64xbf16>
    %cst_8 = arith.constant dense<0.000000e+00> : vector<16x64xf32>
    %10 = tpu.matmul %8, %9, %cst_8 {dimension_numbers = #tpu.dot_dimension_numbers<[1], [0], [0], [1], [0, 0, 1, 1], [], []>} : vector<16x128xbf16>, vector<128x64xbf16>, vector<16x64xf32> -> vector<16x64xf32>
    %c0_9 = arith.constant 0 : index
    %c0_10 = arith.constant 0 : index
    %11 = vector.load %arg11[%c0_9, %c0_10] : memref<1x64xf32, #tpu.memory_space<vmem>>, vector<1x64xf32>
    %12 = vector.broadcast %11 : vector<1x64xf32> to vector<16x64xf32>
    %13 = arith.addf %10, %12 : vector<16x64xf32>
    %cst_11 = arith.constant 0.000000e+00 : f32
    %14 = vector.broadcast %cst_11 : f32 to vector<16x64xf32>
    %15 = arith.maximumf %13, %14 : vector<16x64xf32>
    %16 = arith.truncf %15 : vector<16x64xf32> to vector<16x64xbf16>
    %c0_12 = arith.constant 0 : index
    %c0_13 = arith.constant 0 : index
    %17 = vector.load %arg4[%c0_12, %c0_13] : memref<64x12xbf16, #tpu.memory_space<vmem>>, vector<64x12xbf16>
    %cst_14 = arith.constant dense<0.000000e+00> : vector<16x12xf32>
    %18 = tpu.matmul %16, %17, %cst_14 {dimension_numbers = #tpu.dot_dimension_numbers<[1], [0], [0], [1], [0, 0, 1, 1], [], []>} : vector<16x64xbf16>, vector<64x12xbf16>, vector<16x12xf32> -> vector<16x12xf32>
    %c0_15 = arith.constant 0 : index
    %c0_16 = arith.constant 0 : index
    %19 = vector.load %arg12[%c0_15, %c0_16] : memref<1x12xf32, #tpu.memory_space<vmem>>, vector<1x12xf32>
    %20 = vector.broadcast %19 : vector<1x12xf32> to vector<16x12xf32>
    %21 = arith.addf %18, %20 : vector<16x12xf32>
    %cst_17 = arith.constant 0.000000e+00 : f32
    %22 = vector.broadcast %cst_17 : f32 to vector<16x12xf32>
    %23 = arith.maximumf %21, %22 : vector<16x12xf32>
    %24 = arith.truncf %23 : vector<16x12xf32> to vector<16x12xbf16>
    %c0_18 = arith.constant 0 : index
    %c0_19 = arith.constant 0 : index
    %25 = vector.load %arg5[%c0_18, %c0_19] : memref<12x10xbf16, #tpu.memory_space<vmem>>, vector<12x10xbf16>
    %cst_20 = arith.constant dense<0.000000e+00> : vector<16x10xf32>
    %26 = tpu.matmul %24, %25, %cst_20 {dimension_numbers = #tpu.dot_dimension_numbers<[1], [0], [0], [1], [0, 0, 1, 1], [], []>} : vector<16x12xbf16>, vector<12x10xbf16>, vector<16x10xf32> -> vector<16x10xf32>
    %c0_21 = arith.constant 0 : index
    %c0_22 = arith.constant 0 : index
    %27 = vector.load %arg13[%c0_21, %c0_22] : memref<1x10xf32, #tpu.memory_space<vmem>>, vector<1x10xf32>
    %28 = vector.broadcast %27 : vector<1x10xf32> to vector<16x10xf32>
    %29 = arith.addf %26, %28 : vector<16x10xf32>
    %cst_23 = arith.constant 0.000000e+00 : f32
    %30 = vector.broadcast %cst_23 : f32 to vector<16x10xf32>
    %31 = arith.maximumf %29, %30 : vector<16x10xf32>
    %32 = arith.truncf %31 : vector<16x10xf32> to vector<16x10xbf16>
    %c0_24 = arith.constant 0 : index
    %c0_25 = arith.constant 0 : index
    %33 = vector.load %arg6[%c0_24, %c0_25] : memref<10x12xbf16, #tpu.memory_space<vmem>>, vector<10x12xbf16>
    %cst_26 = arith.constant dense<0.000000e+00> : vector<16x12xf32>
    %34 = tpu.matmul %32, %33, %cst_26 {dimension_numbers = #tpu.dot_dimension_numbers<[1], [0], [0], [1], [0, 0, 1, 1], [], []>} : vector<16x10xbf16>, vector<10x12xbf16>, vector<16x12xf32> -> vector<16x12xf32>
    %c0_27 = arith.constant 0 : index
    %c0_28 = arith.constant 0 : index
    %35 = vector.load %arg14[%c0_27, %c0_28] : memref<1x12xf32, #tpu.memory_space<vmem>>, vector<1x12xf32>
    %36 = vector.broadcast %35 : vector<1x12xf32> to vector<16x12xf32>
    %37 = arith.addf %34, %36 : vector<16x12xf32>
    %cst_29 = arith.constant 0.000000e+00 : f32
    %38 = vector.broadcast %cst_29 : f32 to vector<16x12xf32>
    %39 = arith.maximumf %37, %38 : vector<16x12xf32>
    %40 = arith.truncf %39 : vector<16x12xf32> to vector<16x12xbf16>
    %c0_30 = arith.constant 0 : index
    %c0_31 = arith.constant 0 : index
    %41 = vector.load %arg7[%c0_30, %c0_31] : memref<12x64xbf16, #tpu.memory_space<vmem>>, vector<12x64xbf16>
    %cst_32 = arith.constant dense<0.000000e+00> : vector<16x64xf32>
    %42 = tpu.matmul %40, %41, %cst_32 {dimension_numbers = #tpu.dot_dimension_numbers<[1], [0], [0], [1], [0, 0, 1, 1], [], []>} : vector<16x12xbf16>, vector<12x64xbf16>, vector<16x64xf32> -> vector<16x64xf32>
    %c0_33 = arith.constant 0 : index
    %c0_34 = arith.constant 0 : index
    %43 = vector.load %arg15[%c0_33, %c0_34] : memref<1x64xf32, #tpu.memory_space<vmem>>, vector<1x64xf32>
    %44 = vector.broadcast %43 : vector<1x64xf32> to vector<16x64xf32>
    %45 = arith.addf %42, %44 : vector<16x64xf32>
    %cst_35 = arith.constant 0.000000e+00 : f32
    %46 = vector.broadcast %cst_35 : f32 to vector<16x64xf32>
    %47 = arith.maximumf %45, %46 : vector<16x64xf32>
    %48 = arith.truncf %47 : vector<16x64xf32> to vector<16x64xbf16>
    %c0_36 = arith.constant 0 : index
    %c0_37 = arith.constant 0 : index
    %49 = vector.load %arg8[%c0_36, %c0_37] : memref<64x128xbf16, #tpu.memory_space<vmem>>, vector<64x128xbf16>
    %cst_38 = arith.constant dense<0.000000e+00> : vector<16x128xf32>
    %50 = tpu.matmul %48, %49, %cst_38 {dimension_numbers = #tpu.dot_dimension_numbers<[1], [0], [0], [1], [0, 0, 1, 1], [], []>} : vector<16x64xbf16>, vector<64x128xbf16>, vector<16x128xf32> -> vector<16x128xf32>
    %c0_39 = arith.constant 0 : index
    %c0_40 = arith.constant 0 : index
    %51 = vector.load %arg16[%c0_39, %c0_40] : memref<1x128xf32, #tpu.memory_space<vmem>>, vector<1x128xf32>
    %52 = vector.broadcast %51 : vector<1x128xf32> to vector<16x128xf32>
    %53 = arith.addf %50, %52 : vector<16x128xf32>
    %cst_41 = arith.constant 0.000000e+00 : f32
    %54 = vector.broadcast %cst_41 : f32 to vector<16x128xf32>
    %55 = arith.maximumf %53, %54 : vector<16x128xf32>
    %56 = arith.truncf %55 : vector<16x128xf32> to vector<16x128xbf16>
    %c0_42 = arith.constant 0 : index
    %c0_43 = arith.constant 0 : index
    %57 = vector.load %arg9[%c0_42, %c0_43] : memref<128x784xbf16, #tpu.memory_space<vmem>>, vector<128x784xbf16>
    %cst_44 = arith.constant dense<0.000000e+00> : vector<16x784xf32>
    %58 = tpu.matmul %56, %57, %cst_44 {dimension_numbers = #tpu.dot_dimension_numbers<[1], [0], [0], [1], [0, 0, 1, 1], [], []>} : vector<16x128xbf16>, vector<128x784xbf16>, vector<16x784xf32> -> vector<16x784xf32>
    %c0_45 = arith.constant 0 : index
    %c0_46 = arith.constant 0 : index
    %59 = vector.load %arg17[%c0_45, %c0_46] : memref<1x784xf32, #tpu.memory_space<vmem>>, vector<1x784xf32>
    %60 = vector.broadcast %59 : vector<1x784xf32> to vector<16x784xf32>
    %61 = arith.addf %58, %60 : vector<16x784xf32>
    %62 = arith.negf %61 : vector<16x784xf32>
    %63 = math.exp %62 : vector<16x784xf32>
    %cst_47 = arith.constant 1.000000e+00 : f32
    %64 = vector.broadcast %cst_47 : f32 to vector<16x784xf32>
    %65 = arith.addf %64, %63 : vector<16x784xf32>
    %66 = arith.divf %64, %65 : vector<16x784xf32>
    %67 = arith.truncf %66 : vector<16x784xf32> to vector<16x784xbf16>
    %c0_48 = arith.constant 0 : index
    %c0_49 = arith.constant 0 : index
    %68 = vector.load %arg18[%c0_48, %c0_49] : memref<16x784xbf16, #tpu.memory_space<vmem>>, vector<16x784xbf16>
    tpu.vector_store %arg18[%c0_48, %c0_49], %67 {strides = array<i32>} : memref<16x784xbf16, #tpu.memory_space<vmem>>, vector<16x784xbf16>,
    return
  }
  func.func @transform_0(%arg0: i32) -> (i32, i32) {
    %c0_i32 = arith.constant 0 : i32
    %c0_i32_0 = arith.constant 0 : i32
    return %arg0, %c0_i32 : i32, i32
  }
  func.func @transform_1(%arg0: i32) -> (i32, i32) {
    %c0_i32 = arith.constant 0 : i32
    %c0_i32_0 = arith.constant 0 : i32
    %c0_i32_1 = arith.constant 0 : i32
    return %c0_i32, %c0_i32_0 : i32, i32
  }
  func.func @transform_2(%arg0: i32) -> (i32, i32) {
    %c0_i32 = arith.constant 0 : i32
    %c0_i32_0 = arith.constant 0 : i32
    %c0_i32_1 = arith.constant 0 : i32
    return %c0_i32, %c0_i32_0 : i32, i32
  }
  func.func @transform_3(%arg0: i32) -> (i32, i32) {
    %c0_i32 = arith.constant 0 : i32
    %c0_i32_0 = arith.constant 0 : i32
    %c0_i32_1 = arith.constant 0 : i32
    return %c0_i32, %c0_i32_0 : i32, i32
  }
  func.func @transform_4(%arg0: i32) -> (i32, i32) {
    %c0_i32 = arith.constant 0 : i32
    %c0_i32_0 = arith.constant 0 : i32
    %c0_i32_1 = arith.constant 0 : i32
    return %c0_i32, %c0_i32_0 : i32, i32
  }
  func.func @transform_5(%arg0: i32) -> (i32, i32) {
    %c0_i32 = arith.constant 0 : i32
    %c0_i32_0 = arith.constant 0 : i32
    %c0_i32_1 = arith.constant 0 : i32
    return %c0_i32, %c0_i32_0 : i32, i32
  }
  func.func @transform_6(%arg0: i32) -> (i32, i32) {
    %c0_i32 = arith.constant 0 : i32
    %c0_i32_0 = arith.constant 0 : i32
    %c0_i32_1 = arith.constant 0 : i32
    return %c0_i32, %c0_i32_0 : i32, i32
  }
  func.func @transform_7(%arg0: i32) -> (i32, i32) {
    %c0_i32 = arith.constant 0 : i32
    %c0_i32_0 = arith.constant 0 : i32
    %c0_i32_1 = arith.constant 0 : i32
    return %c0_i32, %c0_i32_0 : i32, i32
  }
  func.func @transform_8(%arg0: i32) -> (i32, i32) {
    %c0_i32 = arith.constant 0 : i32
    %c0_i32_0 = arith.constant 0 : i32
    %c0_i32_1 = arith.constant 0 : i32
    return %c0_i32, %c0_i32_0 : i32, i32
  }
  func.func @transform_9(%arg0: i32) -> (i32, i32) {
    %c0_i32 = arith.constant 0 : i32
    %c0_i32_0 = arith.constant 0 : i32
    %c0_i32_1 = arith.constant 0 : i32
    return %c0_i32, %c0_i32_0 : i32, i32
  }
  func.func @transform_10(%arg0: i32) -> (i32, i32) {
    %c0_i32 = arith.constant 0 : i32
    %c0_i32_0 = arith.constant 0 : i32
    %c0_i32_1 = arith.constant 0 : i32
    return %c0_i32, %c0_i32_0 : i32, i32
  }
  func.func @transform_11(%arg0: i32) -> (i32, i32) {
    %c0_i32 = arith.constant 0 : i32
    %c0_i32_0 = arith.constant 0 : i32
    %c0_i32_1 = arith.constant 0 : i32
    return %c0_i32, %c0_i32_0 : i32, i32
  }
  func.func @transform_12(%arg0: i32) -> (i32, i32) {
    %c0_i32 = arith.constant 0 : i32
    %c0_i32_0 = arith.constant 0 : i32
    %c0_i32_1 = arith.constant 0 : i32
    return %c0_i32, %c0_i32_0 : i32, i32
  }
  func.func @transform_13(%arg0: i32) -> (i32, i32) {
    %c0_i32 = arith.constant 0 : i32
    %c0_i32_0 = arith.constant 0 : i32
    %c0_i32_1 = arith.constant 0 : i32
    return %c0_i32, %c0_i32_0 : i32, i32
  }
  func.func @transform_14(%arg0: i32) -> (i32, i32) {
    %c0_i32 = arith.constant 0 : i32
    %c0_i32_0 = arith.constant 0 : i32
    %c0_i32_1 = arith.constant 0 : i32
    return %c0_i32, %c0_i32_0 : i32, i32
  }
  func.func @transform_15(%arg0: i32) -> (i32, i32) {
    %c0_i32 = arith.constant 0 : i32
    %c0_i32_0 = arith.constant 0 : i32
    %c0_i32_1 = arith.constant 0 : i32
    return %c0_i32, %c0_i32_0 : i32, i32
  }
  func.func @transform_16(%arg0: i32) -> (i32, i32) {
    %c0_i32 = arith.constant 0 : i32
    %c0_i32_0 = arith.constant 0 : i32
    %c0_i32_1 = arith.constant 0 : i32
    return %c0_i32, %c0_i32_0 : i32, i32
  }
  func.func @transform_17(%arg0: i32) -> (i32, i32) {
    %c0_i32 = arith.constant 0 : i32
    %c0_i32_0 = arith.constant 0 : i32
    return %arg0, %c0_i32 : i32, i32
  }
}

</mosaic_0001>

<bundles_post_ra>
// kernel: autoencoder_forward.1
= control target key start
LH: loop header
LB: loop body
LE: loop exit
PB: predicated region body
PF: predicated region fallthrough
CT: control target
= control target key end

     0   :  { %s3810_s0 = inlined_call_operand.vmem [shape: bf16[32,784], index: 0, kind: input, shape index: {}]   ;;  %s3811_s1 = inlined_call_operand.vmem [shape: bf16[784,128], index: 1, kind: input, shape index: {}]   ;;  %s3812_s2 = inlined_call_operand.vmem [shape: bf16[128,64], index: 2, kind: input, shape index: {}]   ;;  %s3813_s3 = inlined_call_operand.vmem [shape: bf16[64,12], index: 3, kind: input, shape index: {}]   ;;  %s3814_s4 = inlined_call_operand.vmem [shape: bf16[12,10], index: 4, kind: input, shape index: {}]   ;;  %s3815_s5 = inlined_call_operand.vmem [shape: bf16[10,12], index: 5, kind: input, shape index: {}]   ;;  %s3816_s6 = inlined_call_operand.vmem [shape: bf16[12,64], index: 6, kind: input, shape index: {}]   ;;  %s3817_s7 = inlined_call_operand.vmem [shape: bf16[64,128], index: 7, kind: input, shape index: {}]   ;;  %s3818_s8 = inlined_call_operand.vmem [shape: bf16[128,784], index: 8, kind: input, shape index: {}]   ;;  %s3819_s9 = inlined_call_operand.vmem [shape: f32[1,128], index: 9, kind: input, shape index: {}]   ;;  %s3820_s10 = inlined_call_operand.vmem [shape: f32[1,64], index: 10, kind: input, shape index: {}]   ;;  %s3821_s11 = inlined_call_operand.vmem [shape: f32[1,12], index: 11, kind: input, shape index: {}]   ;;  %s3822_s12 = inlined_call_operand.vmem [shape: f32[1,10], index: 12, kind: input, shape index: {}]   ;;  %s3823_s13 = inlined_call_operand.vmem [shape: f32[1,12], index: 13, kind: input, shape index: {}]   ;;  %s3824_s14 = inlined_call_operand.vmem [shape: f32[1,64], index: 14, kind: input, shape index: {}]   ;;  %s3825_s15 = inlined_call_operand.vmem [shape: f32[1,128], index: 15, kind: input, shape index: {}]   ;;  %s3826_s16 = inlined_call_operand.vmem [shape: f32[1,784], index: 16, kind: input, shape index: {}]   ;;  %s3827_s17 = inlined_call_operand.hbm [shape: bf16[32,784], index: 17, kind: output, shape index: {}]  }
   0x1   :  { %3836 = sst [smem:[#allocation11_spill]] %s3810_s0 }
   0x2   :  { %3837 = sst [smem:[#allocation12_spill]] %s3811_s1 }
   0x3   :  { %3838 = sst [smem:[#allocation13_spill]] %s3827_s17 }
   0x4   :  { %22 = vsyncpa [#allocation3], 0 }
   0x5   :  { %24 = vsyncpa [#allocation3 + $0x1], 0  ;;  %s3220_s24 = smov 0   ;;  %s3222_s25 = smov 0  }
   0x6   :  { %s3224_s26 = smov 0   ;;  %s3226_s27 = smov 0  }
   0x7 LB: > { %3839 = sst [smem:[#allocation5_spill]] %s3110_s24  ;;  %s3241_s28 = sadd.s32 4294967295, %s3122_s27   ;;  %s3122_s27 = sphi %s3226_s27, %s3853_s27   ;;  %s3118_s26 = sphi %s3224_s26, %s3855_s26   ;;  %s3114_s25 = sphi %s3222_s25, %s3857_s25   ;;  %s3110_s24 = sphi %s3220_s24, %s3856_s24  }
   0x8   : > { %3840 = sst [smem:[#allocation6_spill]] %s3118_s26  ;;  %s2424_s29 = sadd.s32 4294967294, %s3122_s27  }
   0x9   : > { %3841 = sst [smem:[#allocation7_spill]] %s3122_s27  ;;  %s3245_s0 = sadd.s32 1, %s3122_s27  }
   0xa   : > { %3842 = sst [smem:[#allocation8_spill]] %s3245_s0  ;;  %s399_s30 = sadd.s32 1, %s3118_s26 }
   0xb   : > { %s396_s18 = ssub.s32 %s3122_s27, %s3245_s0  ;;  %p409_p0 = scmp.ne.s32.totalorder %s3118_s26, %s3114_s25 }
   0xc   : > { %p397_p1 = scmp.eq.s32.totalorder %s396_s18, 0  ;;  %p410_p2 = scmp.eq.s32.totalorder %s3241_s28, 1 }
   0xd   : > { %p415_p3 = scmp.ne.s32.totalorder %s3114_s25, %s3110_s24  ;;  %p416_p4 = scmp.eq.s32.totalorder %s2424_s29, 1 }
   0xe   : > { %s3256_s19 = scalar_select %p397_p1, %s3118_s26, %s399_s30  }
   0xf   : > { %p3258_p5 = por %p410_p2, %p409_p0  ;;  %p3262_p6 = por %p416_p4, %p415_p3 }
  0x10   : > { %3843 = sst [smem:[#allocation9_spill]] %s3256_s19  ;;  %p2427_p7 = scmp.ge.s32.totalorder %s3122_s27, 1 }
  0x11   : > { %s3845_s20 = scalar_select %p3262_p6, 1, 0 }
  0x12   : > { %p492_p8 = scmp.lt.s32.totalorder %s3122_s27, 3 }
  0x13   : > { %3846 = sst [smem:[#allocation10_spill]] %s3845_s20 }
  0x14   : > { %p493_p9 = pnand %p2427_p7, %p492_p8 }
  0x15   : > { %s3847_s23 = sld [smem:[#allocation12_spill]] (!%p493_p9)  ;;  %s2428_s20 = sshll.u32 (!%p493_p9), %s3241_s28, 1  ;;  %v3124_v38 = vmov (!%p493_p9), 0.0   ;;  %vm3125_vm0 = vmmov (!%p493_p9), 0   ;;  %vm996_vm1 = vcmask (!%p493_p9), 130048   ;;  %v2905_v57 = vld [vmem:[%s3812_s2] sm:$0xff] (!%p493_p9)  }
  0x16   : > { %496 = sbr.rel (%p493_p9) target bundleno = 1931 (0x78b), region = 88  ;;  %p546_p10 = scmp.lt.s32.totalorder (!%p493_p9), %s2428_s20, 3  ;;  %v2906_v58 = vld [vmem:[%s3812_s2 + $0x8] sm:$0xff] (!%p493_p9)   ;;  %v2907_v59 = vld [vmem:[%s3812_s2 + $0x10] sm:$0xff] (!%p493_p9)   ;;  %v2908_v60 = vld [vmem:[%s3812_s2 + $0x18] sm:$0xff] (!%p493_p9)   ;;  %vm1321_vm2 = vcmask (!%p493_p9), 523264  }
  0x17   : > { %s3848_s17 = sld [smem:[#allocation11_spill]] (!%p493_p9)  ;;  %v2909_v61 = vld [vmem:[%s3812_s2 + $0x20] sm:$0xff] (!%p493_p9)   ;;  %v2910_v62 = vld [vmem:[%s3812_s2 + $0x28] sm:$0xff] (!%p493_p9)   ;;  %v2911_v63 = vld [vmem:[%s3812_s2 + $0x30] sm:$0xff] (!%p493_p9)   ;;  %vm1387_vm3 = vcmask (!%p493_p9), 1045504   ;;  %vm1383_vm4 = vcmask (!%p493_p9), 97280  }
  0x18   : > { %vm1453_vm5 = vcmask (!%p493_p9), 1044480   ;;  %vm1449_vm6 = vcmask (!%p493_p9), 80896   ;;  %vm2341_vm7 = vcmask (!%p493_p9), 125952   ;;  %s2801_s22 = smul.u32 (!%p493_p9), 896, %s3241_s28  ;;  %s3849_s19 = sld [smem:[#allocation13_spill]] (!%p493_p9) }
  0x19   : > { %s3127_s24 = smov (!%p493_p9), [#allocation2]  }
  0x1b   : > { %v2846_v0 = vld [vmem:[%s3847_s23 + $0x40] sm:$0xff] (!%p493_p9)   ;;  %v2850_v4 = vld [vmem:[%s3847_s23 + $0x48] sm:$0xff] (!%p493_p9)   ;;  %v2854_v8 = vld [vmem:[%s3847_s23 + $0x50] sm:$0xff] (!%p493_p9)  }
  0x1c   : > { %v2847_v1 = vld [vmem:[%s3847_s23] sm:$0xff] (!%p493_p9)   ;;  %2609 = vmatprep.subr.bf16.mxu0 (!%p493_p9), %v2846_v0  ;;  %v2851_v5 = vld [vmem:[%s3847_s23 + $0x8] sm:$0xff] (!%p493_p9)   ;;  %v2855_v9 = vld [vmem:[%s3847_s23 + $0x10] sm:$0xff] (!%p493_p9)  }
  0x1d   : > { %v2848_v2 = vld [vmem:[%s3847_s23 + $0xc0] sm:$0xff]   ;;  %2610 = vmatpush3.bf16.msra.mxu0 %v2847_v1  ;;  %v2852_v6 = vld [vmem:[%s3847_s23 + $0xc8] sm:$0xff]   ;;  %v2856_v10 = vld [vmem:[%s3847_s23 + $0xd0] sm:$0xff]   ;;  %s3859_s20 = smov (!%p546_p10, %s2428_s20), 3 }
  0x1e   : > { %v2849_v3 = vld [vmem:[%s3847_s23 + $0x80] sm:$0xff]   ;;  %2631 = vmatprep.subr.bf16.mxu1 %v2848_v2  ;;  %2611 = vmatprep.subr.bf16.mxu0 %v2850_v4  ;;  %v2853_v7 = vld [vmem:[%s3847_s23 + $0x88] sm:$0xff]   ;;  %v2857_v11 = vld [vmem:[%s3847_s23 + $0x90] sm:$0xff]   ;;  %s2800_s29 = smul.u32 28, %s3859_s20  ;;  %s3761_s26 = scalar_lea.hbm %s3849_s19, %s2801_s22 }
  0x1f   : > { %2632 = vmatpush3.bf16.msra.mxu1 %v2849_v3  ;;  %v2858_v12 = vld [vmem:[%s3847_s23 + $0x58] sm:$0xff]   ;;  %v2862_v16 = vld [vmem:[%s3847_s23 + $0x60] sm:$0xff]   ;;  %v2866_v20 = vld [vmem:[%s3847_s23 + $0x68] sm:$0xff]  }
  0x20   : > { %2633 = vmatprep.subr.bf16.mxu1 %v2852_v6  ;;  %v2859_v13 = vld [vmem:[%s3847_s23 + $0x18] sm:$0xff]   ;;  %v2863_v17 = vld [vmem:[%s3847_s23 + $0x20] sm:$0xff]   ;;  %v2867_v21 = vld [vmem:[%s3847_s23 + $0x28] sm:$0xff]   ;;  %s3359_s27 = scalar_lea.vmem %s3848_s17, %s2800_s29  ;;  %s542_s29 = sand.u32 1, %s3114_s25  }
  0x21   : > { %2612 = vmatpush3.bf16.msra.mxu0 %v2851_v5  ;;  %v2860_v14 = vld [vmem:[%s3847_s23 + $0xd8] sm:$0xff]   ;;  %v2864_v18 = vld [vmem:[%s3847_s23 + $0xe0] sm:$0xff]   ;;  %v2868_v22 = vld [vmem:[%s3847_s23 + $0xe8] sm:$0xff]   ;;  %s2799_s30 = smul.u32 56, %s542_s29  ;;  %s3769_s28 = scalar_lea.sflag [#allocation3], %s542_s29 }
  0x22   : > { %2613 = vmatprep.subr.bf16.mxu0 %v2854_v8  ;;  %v2861_v15 = vld [vmem:[%s3847_s23 + $0x98] sm:$0xff]   ;;  %v2865_v19 = vld [vmem:[%s3847_s23 + $0xa0] sm:$0xff]   ;;  %v2869_v23 = vld [vmem:[%s3847_s23 + $0xa8] sm:$0xff]   ;;  %s3064_s17 = sshll.u32 %s3127_s24, 4  ;;  %s3065_s17 = int_to_ptr.vmem [resolvable:$false] %s3064_s17 }
  0x23   : > { %2634 = vmatpush3.bf16.msra.mxu1 %v2853_v7  ;;  %v2870_v24 = vld [vmem:[%s3847_s23 + $0x70] sm:$0xff]   ;;  %v2874_v28 = vld [vmem:[%s3847_s23 + $0x78] sm:$0xff]   ;;  %v2879_v32 = vld [vmem:[%s3359_s27 + $0x4] ss:$28 sps:$4 sm:$0xff]   ;;  %s3748_s21 = scalar_lea.vmem [#allocation2], %s2799_s30  ;;  %s3066_s30 = scalar_lea.vmem %s3065_s17, 1792 }
  0x24   : > { %2635 = vmatprep.subr.bf16.mxu1 %v2856_v10  ;;  %v2871_v25 = vld [vmem:[%s3847_s23 + $0x30] sm:$0xff]   ;;  %v2875_v29 = vld [vmem:[%s3847_s23 + $0x38] sm:$0xff]   ;;  %1032 = vmatprep.mubr.bf16.mxu0 %v2879_v32  ;;  %v2881_v34 = vld [vmem:[%s3847_s23 + $0x140] sm:$0xff]   ;;  %s2362_s20 = sshll.u32 %s3748_s21, 4  ;;  %s3763_s20 = int_to_ptr.vmem [resolvable:$true] %s2362_s20 }
  0x25   : > { %2614 = vmatpush3.bf16.msra.mxu0 %v2855_v9  ;;  %v2872_v26 = vld [vmem:[%s3847_s23 + $0xf0] sm:$0xff]   ;;  %v2876_v30 = vld [vmem:[%s3847_s23 + $0xf8] sm:$0xff]   ;;  %v2882_v35 = vld [vmem:[%s3359_s27 + $0x8] ss:$28 sps:$4 sm:$0xff]   ;;  %s3060_s0 = scalar_lea.vmem %s3763_s20, 896  ;;  %p3067_p0 = scmp.lt.s32.totalorder %s3763_s20, %s3065_s17 }
  0x26   : > { %2615 = vmatprep.subr.bf16.mxu0 %v2858_v12  ;;  %v2873_v27 = vld [vmem:[%s3847_s23 + $0xb0] sm:$0xff]   ;;  %v2877_v31 = vld [vmem:[%s3359_s27] ss:$28 sps:$4 sm:$0xff]   ;;  %v2884_v36 = vld [vmem:[%s3359_s27 + $0xc] ss:$28 sps:$4 sm:$0xff]   ;;  %p3061_p11 = scmp.ne.s32.totalorder %s3763_s20, %s3060_s0  ;;  %p3068_p1 = scmp.lt.s32.totalorder %s3066_s30, %s3060_s0 }
  0x27   : > { %2636 = vmatpush3.bf16.msra.mxu1 %v2857_v11  ;;  %v2880_v33 = vld [vmem:[%s3847_s23 + $0xb8] sm:$0xff]   ;;  %v2885_v37 = vld [vmem:[%s3847_s23 + $0x100] sm:$0xff]   ;;  %1073 = vmatprep.mubr.bf16.mxu1 %v2884_v36  ;;  %v2886_v39 = vld [vmem:[%s3847_s23 + $0x148] sm:$0xff]  }
  0x28   : > { %2637 = vmatprep.subr.bf16.mxu1 %v2860_v14  ;;  %v2887_v40 = vld [vmem:[%s3847_s23 + $0x108] sm:$0xff]   ;;  %v2888_v41 = vld [vmem:[%s3847_s23 + $0x150] sm:$0xff]   ;;  %v2890_v43 = vld [vmem:[%s3847_s23 + $0x158] sm:$0xff]   ;;  %p3062_p12 = pnand %p3061_p11, %p3258_p5  ;;  %p3069_p2 = por %p3068_p1, %p3067_p0 }
  0x29   : > { %2616 = vmatpush3.bf16.msra.mxu0 %v2859_v13  ;;  %v2889_v42 = vld [vmem:[%s3847_s23 + $0x110] sm:$0xff]   ;;  %v2891_v44 = vld [vmem:[%s3847_s23 + $0x118] sm:$0xff]   ;;  %v2892_v45 = vld [vmem:[%s3847_s23 + $0x160] sm:$0xff]  }
  0x2a   : > { %2617 = vmatprep.subr.bf16.mxu0 %v2862_v16  ;;  %v2893_v46 = vld [vmem:[%s3847_s23 + $0x120] sm:$0xff]   ;;  %v2894_v47 = vld [vmem:[%s3847_s23 + $0x168] sm:$0xff]   ;;  %v2903_v50 = vld [vmem:[%s3359_s27 + $0x14] ss:$28 sps:$4 sm:$0xff]   ;;  %p3063_p13 = pneg %p3062_p12 }
  0x2b   : > { %2638 = vmatpush3.bf16.msra.mxu1 %v2861_v15  ;;  %v2900_v48 = vld [vmem:[%s3847_s23 + $0x180] sm:$0xff]   ;;  %v2895_v49 = vld [vmem:[%s3847_s23 + $0x128] sm:$0xff]   ;;  %v2896_v51 = vld [vmem:[%s3847_s23 + $0x170] sm:$0xff]  }
  0x2c   : > { %2639 = vmatprep.subr.bf16.mxu1 %v2864_v18  ;;  %v2904_v52 = vld [vmem:[%s3359_s27 + $0x18] ss:$28 sps:$4 sm:$0xff]   ;;  %v2901_v56 = vld [vmem:[%s3359_s27 + $0x10] ss:$28 sps:$4 sm:$0xff]   ;;  %v2913_v1 = vld [vmem:[%s3813_s3] sm:$0xff]   ;;  %p3070_p3 = pnand %p3069_p2, %p3063_p13 }
  0x2d   : > { %2618 = vmatpush3.bf16.msra.mxu0 %v2863_v17  ;;  %v2897_v53 = vld [vmem:[%s3847_s23 + $0x130] sm:$0xff]   ;;  %v2898_v54 = vld [vmem:[%s3847_s23 + $0x178] sm:$0xff]   ;;  %v2914_v2 = vld [vmem:[%s3813_s3 + $0x8] sm:$0xff]  }
  0x2e   : > { %2619 = vmatprep.subr.bf16.mxu0 %v2866_v20  ;;  %v2899_v55 = vld [vmem:[%s3847_s23 + $0x138] sm:$0xff]   ;;  %v2430_v4 = vld [vmem:[%s3819_s9] ss:$0 sm:$0xff] }
  0x2f   : > { %2640 = vmatpush3.bf16.msra.mxu1 %v2865_v19  ;;  %v2912_v0 = vld [vmem:[%s3812_s2 + $0x38] sm:$0xff]  }
  0x30   : > { %2641 = vmatprep.subr.bf16.mxu1 %v2868_v22 }
  0x31   : > { %2620 = vmatpush3.bf16.msra.mxu0 %v2867_v21 }
  0x32   : > { %2621 = vmatprep.subr.bf16.mxu0 %v2870_v24 }
  0x33   : > { %2642 = vmatpush3.bf16.msra.mxu1 %v2869_v23 }
  0x34   : > { %2643 = vmatprep.subr.bf16.mxu1 %v2872_v26 }
  0x35   : > { %2622 = vmatpush3.bf16.msra.mxu0 %v2871_v25 }
  0x36   : > { %2623 = vmatprep.subr.bf16.mxu0 %v2874_v28 }
  0x37   : > { %2644 = vmatpush3.bf16.msra.mxu1 %v2873_v27 }
  0x38   : > { %2645 = vmatprep.subr.bf16.mxu1 %v2876_v30 }
  0x39   : > { %2624 = vmatpush3.bf16.msra.mxu0 %v2875_v29 }
  0x3a   : > { %2653 = vmatprep.subr.bf16.mxu0 %v2881_v34 }
  0x3b   : > { %2646 = vmatpush3.bf16.msra.mxu1 %v2880_v33 }
  0x3c   : > { %1033 = vmatmul.mubr.bf16.vlgmr.msra.gmra.mrb[0].mxu0 %v2877_v31  ;;  %2711 = vmatprep.subr.bf16.mxu1 %v3124_v38 }
  0x3d   : > { %2654 = vmatpush3.bf16.msra.mxu0 %v2885_v37  ;;  %1114 = vmatprep.mubr.bf16.mxu0 %v2903_v50  ;;  %v2915_v37 = vld [vmem:[%s3813_s3 + $0x10] sm:$0xff]   ;;  %v2917_v50 = vld [vmem:[%s3814_s4] sm:$0x3f]  }
  0x3e   : > { %1074 = vmatmul.mubr.bf16.vlgmr.msra.gmra.mrb[0].mxu1 %v2882_v35  ;;  %2655 = vmatprep.subr.bf16.mxu0 %v2886_v39  ;;  %v2916_v39 = vld [vmem:[%s3813_s3 + $0x18] sm:$0xff]  }
  0x3f   : > { %2713 = vmatprep.mubr.msk.bf16.mxu1 %vm3125_vm0, %v3124_v38  ;;  %2712 = vmatpush3.bf16.msra.mxu1 %v2900_v48 }
  0x40   : > { %2717 = vmatprep.subr.bf16.mxu1 %v3124_v38 }
  0x41   : > { %2656 = vmatpush3.bf16.msra.mxu0 %v2887_v40  ;;  %v2488_v40 = vld [vmem:[%s3820_s10] ss:$0 sm:$0xff] }
  0x42   : > { %2657 = vmatprep.subr.bf16.mxu0 %v2888_v41 }
  0x45   : > { %2658 = vmatpush3.bf16.msra.mxu0 %v2889_v42 }
  0x46   : > { %2659 = vmatprep.subr.bf16.mxu0 %v2890_v43  ;;  %2714 = vmatmul.mubr.msk.bf16.vlgmr.msra.gmra.mrb[4].mxu1 %vm996_vm1, %v2904_v52  ;;  %v2497_v52 = vld [vmem:[%s3821_s11] ss:$0 sm:$0xff] }
  0x47   : > { %2733 = vmatprep.mubr.msk.bf16.mxu1 %vm3125_vm0, %v3124_v38  ;;  %2718 = vmatpush3.bf16.msra.mxu1 %v2905_v57 }
  0x48   : > { %2719 = vmatprep.subr.bf16.mxu1 %v3124_v38 }
  0x49   : > { %2660 = vmatpush3.bf16.msra.mxu0 %v2891_v44 }
  0x4a   : > { %2661 = vmatprep.subr.bf16.mxu0 %v2892_v45 }
  0x4b   : > { %2720 = vmatpush3.bf16.msra.mxu1 %v2906_v58 }
  0x4c   : > { %2721 = vmatprep.subr.bf16.mxu1 %v3124_v38 }
  0x4d   : > { %2662 = vmatpush3.bf16.msra.mxu0 %v2893_v46 }
  0x4e   : > { %2663 = vmatprep.subr.bf16.mxu0 %v2894_v47 }
  0x4f   : > { %2722 = vmatpush3.bf16.msra.mxu1 %v2907_v59 }
  0x50   : > { %2723 = vmatprep.subr.bf16.mxu1 %v3124_v38 }
  0x51   : > { %2664 = vmatpush3.bf16.msra.mxu0 %v2895_v49 }
  0x52   : > { %2665 = vmatprep.subr.bf16.mxu0 %v2896_v51  ;;  %v1389_v51 = vsel %vm1387_vm3, %v2917_v50, 0 }
  0x53   : > { %2724 = vmatpush3.bf16.msra.mxu1 %v2908_v60 }
  0x54   : > { %2725 = vmatprep.subr.bf16.mxu1 %v3124_v38 }
  0x55   : > { %2666 = vmatpush3.bf16.msra.mxu0 %v2897_v53 }
  0x56   : > { %2667 = vmatprep.subr.bf16.mxu0 %v2898_v54 }
  0x57   : > { %2726 = vmatpush3.bf16.msra.mxu1 %v2909_v61 }
  0x58   : > { %2727 = vmatprep.subr.bf16.mxu1 %v3124_v38 }
  0x59   : > { %2668 = vmatpush3.bf16.msra.mxu0 %v2899_v55 }
  0x5a   : > { %2737 = vmatprep.subr.bf16.mxu0 %v3124_v38 }
  0x5b   : > { %2728 = vmatpush3.bf16.msra.mxu1 %v2910_v62  ;;  %v2918_v62 = vld [vmem:[%s3815_s5] sm:$0x1f]  }
  0x5c   : > { %1115 = vmatmul.mubr.bf16.vlgmr.msra.gmra.mrb[4].mxu0 %v2901_v56  ;;  %2729 = vmatprep.subr.bf16.mxu1 %v3124_v38 }
  0x5d   : > { %2745 = vmatprep.mubr.msk.bf16.mxu0 %vm3125_vm0, %v3124_v38  ;;  %2738 = vmatpush3.bf16.msra.mxu0 %v2913_v1 }
  0x5e   : > { %2739 = vmatprep.subr.bf16.mxu0 %v3124_v38 }
  0x5f   : > { %2730 = vmatpush3.bf16.msra.mxu1 %v2911_v63  ;;  %v1455_v63 = vsel %vm1453_vm5, %v2918_v62, 0  ;;  %v2965_v62 = vld [vmem:[%s3818_s8 + $0x15c] ss:$28 sps:$4 sm:$0xff]  }
  0x60   : > { %2731 = vmatprep.subr.bf16.mxu1 %v3124_v38 }
  0x61   : > { %2740 = vmatpush3.bf16.msra.mxu0 %v2914_v2 }
  0x62   : > { %2741 = vmatprep.subr.bf16.mxu0 %v3124_v38 }
  0x63   : > { %2732 = vmatpush3.bf16.msra.mxu1 %v2912_v0  ;;  %v2503_v0 = vld [vmem:[%s3822_s12] ss:$0 sm:$0xff] }
  0x64   : > { %2749 = vmatprep.subr.bf16.mxu1 %v3124_v38 }
  0x65   : > { %2742 = vmatpush3.bf16.msra.mxu0 %v2915_v37  ;;  %v2956_v37 = vld [vmem:[%s3818_s8 + $0x11c] ss:$28 sps:$4 sm:$0xff]  }
  0x66   : > { %2743 = vmatprep.subr.bf16.mxu0 %v3124_v38 }
  0x69   : > { %2744 = vmatpush3.bf16.msra.mxu0 %v2916_v39  ;;  %v2954_v39 = vld [vmem:[%s3818_s8 + $0x118] ss:$28 sps:$4 sm:$0xff]  }
  0x6a   : > { %2767 = vmatprep.subr.bf16.mxu0 %v3124_v38 }
 0x10f   : > { %v2625_v3 = vpop.f32.mrb[0].mxu0 }
 0x110   : > { %v2626_v5 = vpop.f32.mrb[1].mxu0 }
 0x111   : > { %v2627_v6 = vadd.f32 %v2626_v5, %v2625_v3  ;;  %v2628_v7 = vpop.f32.mrb[2].mxu0  ;;  %v2647_v8 = vpop.f32.mrb[0].mxu1 }
 0x112   : > { %v2629_v9 = vpop.f32.mrb[3].mxu0  ;;  %v2648_v12 = vpop.f32.mrb[1].mxu1 }
 0x113   : > { %v1035_v10 = vadd.f32 %v2627_v6, %v2430_v4  ;;  %v2630_v11 = vadd.f32 %v2629_v9, %v2628_v7  ;;  %v2649_v13 = vadd.f32 %v2648_v12, %v2647_v8  ;;  %v2650_v14 = vpop.f32.mrb[2].mxu1  ;;  %v2920_v12 = vld [vmem:[%s3817_s7] sm:$0xff]  }
 0x114   : > { %v2651_v16 = vpop.f32.mrb[3].mxu1 }
 0x115   : > { %v1038_v15 = vadd.f32 %v2630_v11, %v2430_v4  ;;  %v1076_v17 = vadd.f32 %v2649_v13, %v1035_v10  ;;  %v2652_v18 = vadd.f32 %v2651_v16, %v2650_v14  ;;  %v2919_v10 = vld [vmem:[%s3816_s6] sm:$0x3f]   ;;  %v2921_v13 = vld [vmem:[%s3817_s7 + $0x8] sm:$0xff]  }
 0x116   : > { %v1519_v11 = vsel %vm1387_vm3, %v2919_v10, 0  ;;  %v2506_v14 = vld [vmem:[%s3823_s13] ss:$0 sm:$0xff] }
 0x117   : > { %v1079_v19 = vadd.f32 %v2652_v18, %v1038_v15 }
 0x119   : > { %v1157_v20 = vpop.f32.mrb[4].mxu1 }
 0x11a   : > { %v2715_v21 = vpop.f32.mrb[5].mxu1 }
 0x11b   : > { %v1160_v22 = vpop.f32.mrb[6].mxu1 }
 0x11c   : > { %v2716_v23 = vpop.f32.mrb[7].mxu1 }
 0x12f   : > { %v2669_v24 = vpop.f32.mrb[4].mxu0 }
 0x130   : > { %v2670_v25 = vpop.f32.mrb[5].mxu0 }
 0x131   : > { %v2671_v26 = vadd.f32 %v2670_v25, %v2669_v24  ;;  %v2672_v27 = vpop.f32.mrb[6].mxu0  ;;  %v2922_v24 = vld [vmem:[%s3817_s7 + $0x10] sm:$0xff]   ;;  %v2923_v25 = vld [vmem:[%s3817_s7 + $0x18] sm:$0xff]  }
 0x132   : > { %v2673_v28 = vpop.f32.mrb[7].mxu0 }
 0x133   : > { %v1117_v29 = vadd.f32 %v2671_v26, %v1076_v17  ;;  %v2674_v30 = vadd.f32 %v2673_v28, %v2672_v27  ;;  %v2924_v26 = vld [vmem:[%s3818_s8] ss:$28 sps:$4 sm:$0xff]   ;;  %v2929_v28 = vld [vmem:[%s3818_s8 + $0xc] ss:$28 sps:$4 sm:$0xff]  }
 0x134   : > { %v2926_v27 = vld [vmem:[%s3818_s8 + $0x4] ss:$28 sps:$4 sm:$0xff]  }
 0x135   : > { %v1158_v31 = vadd.f32 %v1157_v20, %v1117_v29  ;;  %v1120_v32 = vadd.f32 %v2674_v30, %v1079_v19  ;;  %v2932_v29 = vld [vmem:[%s3818_s8 + $0x3c] ss:$28 sps:$4 sm:$0xff]  }
 0x136   : > { %v2930_v30 = vld [vmem:[%s3818_s8 + $0x38] ss:$28 sps:$4 sm:$0xff]  }
 0x137   : > { %v1161_v33 = vadd.f32 %v1160_v22, %v1120_v32  ;;  %v1164_v34 = vmax.f32 %v1158_v31, 0.0  ;;  %v2938_v31 = vld [vmem:[%s3818_s8 + $0x74] ss:$28 sps:$4 sm:$0xff]  }
 0x138   : > { %v2936_v32 = vld [vmem:[%s3818_s8 + $0x70] ss:$28 sps:$4 sm:$0xff]  }
 0x139   : > { %v1165_v35 = vmax.f32 %v1161_v33, 0.0  ;;  %v2944_v33 = vld [vmem:[%s3818_s8 + $0xac] ss:$28 sps:$4 sm:$0xff]  }
 0x13b   : > { %v1166_v36 = vpack.c.bf16 %v1165_v35, %v1164_v34  ;;  %v2942_v34 = vld [vmem:[%s3818_s8 + $0xa8] ss:$28 sps:$4 sm:$0xff]  }
 0x13c   : > { %v2950_v35 = vld [vmem:[%s3818_s8 + $0xe4] ss:$28 sps:$4 sm:$0xff]  }
 0x13d   : > { %2734 = vmatmul.mubr.bf16.vlgmr.msra.gmra.mrb[8].mxu1 %v1166_v36  ;;  %v2948_v36 = vld [vmem:[%s3818_s8 + $0xe0] ss:$28 sps:$4 sm:$0xff]  }
 0x13e   : > { %2751 = vmatprep.mubr.msk.bf16.mxu1 %vm3125_vm0, %v3124_v38  ;;  %2750 = vmatpush3.bf16.msra.mxu1 %v1389_v51  ;;  %v2935_v51 = vld [vmem:[%s3818_s8 + $0x44] ss:$28 sps:$4 sm:$0xff]  }
 0x13f   : > { %2755 = vmatprep.subr.bf16.mxu1 %v3124_v38 }
 0x210   : > { %v1272_v41 = vpop.f32.mrb[8].mxu1 }
 0x211   : > { %v1273_v42 = vadd.f32 %v2488_v40, %v1272_v41  ;;  %v2735_v43 = vpop.f32.mrb[9].mxu1 }
 0x212   : > { %v1275_v44 = vpop.f32.mrb[10].mxu1 }
 0x213   : > { %v1276_v45 = vadd.f32 %v2488_v40, %v1275_v44  ;;  %v2736_v46 = vpop.f32.mrb[11].mxu1  ;;  %v1279_v47 = vmax.f32 %v1273_v42, 0.0  ;;  %v2509_v40 = vld [vmem:[%s3824_s14] ss:$0 sm:$0xff] }
 0x215   : > { %v1280_v48 = vmax.f32 %v1276_v45, 0.0 }
 0x217   : > { %v1281_v49 = vpack.c.bf16 %v1280_v48, %v1279_v47 }
 0x219   : > { %2746 = vmatmul.mubr.msk.bf16.vlgmr.msra.gmra.mrb[8].mxu0 %vm1321_vm2, %v1281_v49  ;;  %v2927_v49 = vld [vmem:[%s3818_s8 + $0x8] ss:$28 sps:$4 sm:$0xff]  }
 0x21a   : > { %2775 = vmatprep.mubr.msk.bf16.mxu0 %vm3125_vm0, %v3124_v38  ;;  %2768 = vmatpush3.bf16.msra.mxu0 %v2920_v12 }
 0x21b   : > { %2769 = vmatprep.subr.bf16.mxu0 %v3124_v38 }
 0x21e   : > { %2770 = vmatpush3.bf16.msra.mxu0 %v2921_v13 }
 0x21f   : > { %2771 = vmatprep.subr.bf16.mxu0 %v3124_v38 }
 0x222   : > { %2772 = vmatpush3.bf16.msra.mxu0 %v2922_v24  ;;  %v2983_v24 = vld [vmem:[%s3818_s8 + $0x88] ss:$28 sps:$4 sm:$0xff]  }
 0x223   : > { %2773 = vmatprep.subr.bf16.mxu0 %v3124_v38 }
 0x226   : > { %2774 = vmatpush3.bf16.msra.mxu0 %v2923_v25  ;;  %v2986_v25 = vld [vmem:[%s3818_s8 + $0xbc] ss:$28 sps:$4 sm:$0xff]  }
 0x227   : > { %2083 = vmatprep.subr.bf16.mxu0 %v2929_v28  ;;  %v2990_v28 = vld [vmem:[%s3818_s8 + $0xf4] ss:$28 sps:$4 sm:$0xff]  }
 0x2ec   : > { %v1359_v53 = vpop.f32.mrb[8].mxu0 }
 0x2ed   : > { %v1360_v54 = vadd.f32 %v2497_v52, %v1359_v53  ;;  %v2747_v55 = vpop.f32.mrb[9].mxu0  ;;  %v2941_v53 = vld [vmem:[%s3818_s8 + $0x7c] ss:$28 sps:$4 sm:$0xff]  }
 0x2ee   : > { %v1362_v56 = vpop.f32.mrb[10].mxu0  ;;  %v2947_v55 = vld [vmem:[%s3818_s8 + $0xb4] ss:$28 sps:$4 sm:$0xff]  }
 0x2ef   : > { %v1363_v57 = vadd.f32 %v2497_v52, %v1362_v56  ;;  %v2748_v58 = vpop.f32.mrb[11].mxu0  ;;  %v1366_v59 = vmax.f32 %v1360_v54, 0.0  ;;  %v2933_v52 = vld [vmem:[%s3818_s8 + $0x40] ss:$28 sps:$4 sm:$0xff]   ;;  %v2939_v54 = vld [vmem:[%s3818_s8 + $0x78] ss:$28 sps:$4 sm:$0xff]  }
 0x2f0   : > { %v2945_v56 = vld [vmem:[%s3818_s8 + $0xb0] ss:$28 sps:$4 sm:$0xff]   ;;  %v2951_v58 = vld [vmem:[%s3818_s8 + $0xe8] ss:$28 sps:$4 sm:$0xff]  }
 0x2f1   : > { %v1367_v60 = vmax.f32 %v1363_v57, 0.0  ;;  %v2953_v57 = vld [vmem:[%s3818_s8 + $0xec] ss:$28 sps:$4 sm:$0xff]  }
 0x2f3   : > { %v1368_v61 = vpack.c.bf16 %v1367_v60, %v1366_v59  ;;  %v2959_v59 = vld [vmem:[%s3818_s8 + $0x124] ss:$28 sps:$4 sm:$0xff]  }
 0x2f4   : > { %v2957_v60 = vld [vmem:[%s3818_s8 + $0x120] ss:$28 sps:$4 sm:$0xff]  }
 0x2f5   : > { %2752 = vmatmul.mubr.msk.bf16.vlgmr.msra.gmra.mrb[12].mxu1 %vm1383_vm4, %v1368_v61  ;;  %v2962_v61 = vld [vmem:[%s3818_s8 + $0x154] ss:$28 sps:$4 sm:$0xff]  }
 0x2f6   : > { %2757 = vmatprep.mubr.msk.bf16.mxu1 %vm3125_vm0, %v3124_v38  ;;  %2756 = vmatpush3.bf16.msra.mxu1 %v1455_v63  ;;  %v2960_v63 = vld [vmem:[%s3818_s8 + $0x150] ss:$28 sps:$4 sm:$0xff]  }
 0x2f7   : > { %2761 = vmatprep.subr.bf16.mxu1 %v3124_v38 }
 0x3c8   : > { %v1425_v1 = vpop.f32.mrb[12].mxu1 }
 0x3c9   : > { %v1426_v2 = vadd.f32 %v2503_v0, %v1425_v1  ;;  %v2753_v3 = vpop.f32.mrb[13].mxu1  ;;  %v2968_v1 = vld [vmem:[%s3818_s8 + $0x18c] ss:$28 sps:$4 sm:$0xff]  }
 0x3ca   : > { %v1428_v4 = vpop.f32.mrb[14].mxu1  ;;  %v2966_v3 = vld [vmem:[%s3818_s8 + $0x188] ss:$28 sps:$4 sm:$0xff]  }
 0x3cb   : > { %v1429_v5 = vadd.f32 %v2503_v0, %v1428_v4  ;;  %v2754_v6 = vpop.f32.mrb[15].mxu1  ;;  %v1432_v7 = vmax.f32 %v1426_v2, 0.0  ;;  %v2963_v0 = vld [vmem:[%s3818_s8 + $0x158] ss:$28 sps:$4 sm:$0xff]   ;;  %v2969_v4 = vld [vmem:[%s3818_s8 + $0x190] ss:$28 sps:$4 sm:$0xff]  }
 0x3cc   : > { %v2971_v2 = vld [vmem:[%s3818_s8 + $0x194] ss:$28 sps:$4 sm:$0xff]   ;;  %v3126_v6 = vmov 0  }
 0x3cd   : > { %v1433_v8 = vmax.f32 %v1429_v5, 0.0  ;;  %v2974_v5 = vld [vmem:[%s3818_s8 + $0x14] ss:$28 sps:$4 sm:$0xff]  }
 0x3cf   : > { %v1434_v9 = vpack.c.bf16 %v1433_v8, %v1432_v7  ;;  %v2512_v7 = vld [vmem:[%s3825_s15] ss:$0 sm:$0xff] }
 0x3d1   : > { %2758 = vmatmul.mubr.msk.bf16.vlgmr.msra.gmra.mrb[16].mxu1 %vm1449_vm6, %v1434_v9 }
 0x3d2   : > { %2763 = vmatprep.mubr.msk.bf16.mxu1 %vm3125_vm0, %v3124_v38  ;;  %2762 = vmatpush3.bf16.msra.mxu1 %v1519_v11 }
 0x3d3   : > { %2040 = vmatprep.subr.bf16.mxu1 %v2926_v27  ;;  %v2987_v27 = vld [vmem:[%s3818_s8 + $0xc0] ss:$28 sps:$4 sm:$0xff]  }
 0x4a4   : > { %v1491_v15 = vpop.f32.mrb[16].mxu1 }
 0x4a5   : > { %v1492_v16 = vadd.f32 %v2506_v14, %v1491_v15  ;;  %v2759_v17 = vpop.f32.mrb[17].mxu1 }
 0x4a6   : > { %v1494_v18 = vpop.f32.mrb[18].mxu1  ;;  %v2975_v17 = vld [vmem:[%s3818_s8 + $0x18] ss:$28 sps:$4 sm:$0xff]  }
 0x4a7   : > { %v1495_v19 = vadd.f32 %v2506_v14, %v1494_v18  ;;  %v2760_v20 = vpop.f32.mrb[19].mxu1  ;;  %v1498_v21 = vmax.f32 %v1492_v16, 0.0  ;;  %v2972_v16 = vld [vmem:[%s3818_s8 + $0x10] ss:$28 sps:$4 sm:$0xff]  }
 0x4a8   : > { %v2976_v20 = vld [vmem:[%s3818_s8 + $0x48] ss:$28 sps:$4 sm:$0xff]  }
 0x4a9   : > { %v1499_v22 = vmax.f32 %v1495_v19, 0.0  ;;  %v2978_v19 = vld [vmem:[%s3818_s8 + $0x4c] ss:$28 sps:$4 sm:$0xff]  }
 0x4ab   : > { %v1500_v23 = vpack.c.bf16 %v1499_v22, %v1498_v21  ;;  %v2979_v21 = vld [vmem:[%s3818_s8 + $0x50] ss:$28 sps:$4 sm:$0xff]   ;;  %v2982_v22 = vld [vmem:[%s3818_s8 + $0x84] ss:$28 sps:$4 sm:$0xff]  }
 0x4ad   : > { %2764 = vmatmul.mubr.msk.bf16.vlgmr.msra.gmra.mrb[20].mxu1 %vm1383_vm4, %v1500_v23  ;;  %v2980_v23 = vld [vmem:[%s3818_s8 + $0x80] ss:$28 sps:$4 sm:$0xff]  }
 0x4ae   : > { %2041 = vmatpush1.bf16.msra.mxu1 %v2924_v26  ;;  %2072 = vmatprep.mubr.bf16.mxu1 %v3126_v6  ;;  %v2984_v26 = vld [vmem:[%s3818_s8 + $0xb8] ss:$28 sps:$4 sm:$0xff]  }
 0x4af   : > { %2042 = vmatprep.subr.bf16.mxu1 %v2932_v29  ;;  %v2988_v29 = vld [vmem:[%s3818_s8 + $0xf0] ss:$28 sps:$4 sm:$0xff]  }
 0x4b2   : > { %2043 = vmatpush1.bf16.msra.mxu1 %v2930_v30  ;;  %v2991_v30 = vld [vmem:[%s3818_s8 + $0xf8] ss:$28 sps:$4 sm:$0xff]  }
 0x4b3   : > { %2044 = vmatprep.subr.bf16.mxu1 %v2938_v31  ;;  %v2994_v31 = vld [vmem:[%s3818_s8 + $0x12c] ss:$28 sps:$4 sm:$0xff]  }
 0x4b6   : > { %2045 = vmatpush1.bf16.msra.mxu1 %v2936_v32  ;;  %v2992_v32 = vld [vmem:[%s3818_s8 + $0x128] ss:$28 sps:$4 sm:$0xff]  }
 0x4b7   : > { %2046 = vmatprep.subr.bf16.mxu1 %v2944_v33  ;;  %v2995_v33 = vld [vmem:[%s3818_s8 + $0x130] ss:$28 sps:$4 sm:$0xff]  }
 0x4ba   : > { %2047 = vmatpush1.bf16.msra.mxu1 %v2942_v34  ;;  %v2998_v34 = vld [vmem:[%s3818_s8 + $0x164] ss:$28 sps:$4 sm:$0xff]  }
 0x4bb   : > { %2048 = vmatprep.subr.bf16.mxu1 %v2950_v35  ;;  %v2996_v35 = vld [vmem:[%s3818_s8 + $0x160] ss:$28 sps:$4 sm:$0xff]  }
 0x4be   : > { %2049 = vmatpush1.bf16.msra.mxu1 %v2948_v36  ;;  %v2999_v36 = vld [vmem:[%s3818_s8 + $0x168] ss:$28 sps:$4 sm:$0xff]  }
 0x4bf   : > { %2050 = vmatprep.subr.bf16.mxu1 %v2956_v37  ;;  %v3002_v37 = vld [vmem:[%s3818_s8 + $0x19c] ss:$28 sps:$4 sm:$0xff]  }
 0x4c2   : > { %2051 = vmatpush1.bf16.msra.mxu1 %v2954_v39  ;;  %v3000_v39 = vld [vmem:[%s3818_s8 + $0x198] ss:$28 sps:$4 sm:$0xff]  }
 0x4c3   : > { %2052 = vmatprep.subr.bf16.mxu1 %v2962_v61 }
 0x4c6   : > { %2053 = vmatpush1.bf16.msra.mxu1 %v2960_v63 }
 0x4c7   : > { %2054 = vmatprep.subr.bf16.mxu1 %v2968_v1 }
 0x4ca   : > { %2055 = vmatpush1.bf16.msra.mxu1 %v2966_v3 }
 0x4cb   : > { %2126 = vmatprep.subr.bf16.mxu1 %v2974_v5 }
 0x580   : > { %v1555_v41 = vpop.f32.mrb[20].mxu1 }
 0x581   : > { %v1556_v42 = vadd.f32 %v2509_v40, %v1555_v41  ;;  %v2765_v43 = vpop.f32.mrb[21].mxu1  ;;  %v1717_v41 = vlaneseq }
 0x582   : > { %v1558_v44 = vpop.f32.mrb[22].mxu1 }
 0x583   : > { %v1559_v45 = vadd.f32 %v2509_v40, %v1558_v44  ;;  %v2766_v46 = vpop.f32.mrb[23].mxu1  ;;  %v1562_v47 = vmax.f32 %v1556_v42, 0.0  ;;  %v3003_v40 = vld [vmem:[%s3818_s8 + $0x1a0] ss:$28 sps:$4 sm:$0xff]   ;;  %v3724_v42 = vshrl.u32 %v1717_v41, 7 }
 0x585   : > { %v1563_v48 = vmax.f32 %v1559_v45, 0.0  ;;  %v1719_v43 = vsub.s32 0, %v3724_v42  ;;  %v1727_v44 = vsub.s32 2, %v3724_v42  ;;  %v3731_v45 = vld [vmem:[%s3826_s16] sm:$0x7f]  ;;  %v1723_v46 = vsub.s32 1, %v3724_v42 }
 0x587   : > { %v1564_v50 = vpack.c.bf16 %v1563_v48, %v1562_v47  ;;  %v1720_v47 = vrot.slane %v3731_v45, %v1719_v43  ;;  %v1728_v48 = vrot.slane %v3731_v45, %v1727_v44 }
 0x589   : > { %2776 = vmatmul.mubr.msk.bf16.vlgmr.msra.gmra.mrb[12].mxu0 %vm1321_vm2, %v1564_v50 }
 0x58a   : > { %2084 = vmatpush1.bf16.msra.mxu0 %v2927_v49  ;;  %2115 = vmatprep.mubr.bf16.mxu0 %v3126_v6  ;;  %v1724_v49 = vrot.slane %v3731_v45, %v1723_v46 }
 0x58b   : > { %2085 = vmatprep.subr.bf16.mxu0 %v2935_v51 }
 0x58e   : > { %2086 = vmatpush1.bf16.msra.mxu0 %v2933_v52 }
 0x58f   : > { %2087 = vmatprep.subr.bf16.mxu0 %v2941_v53 }
 0x592   : > { %2088 = vmatpush1.bf16.msra.mxu0 %v2939_v54 }
 0x593   : > { %2089 = vmatprep.subr.bf16.mxu0 %v2947_v55 }
 0x596   : > { %2090 = vmatpush1.bf16.msra.mxu0 %v2945_v56 }
 0x597   : > { %2091 = vmatprep.subr.bf16.mxu0 %v2953_v57 }
 0x59a   : > { %2092 = vmatpush1.bf16.msra.mxu0 %v2951_v58 }
 0x59b   : > { %2093 = vmatprep.subr.bf16.mxu0 %v2959_v59 }
 0x59e   : > { %2094 = vmatpush1.bf16.msra.mxu0 %v2957_v60 }
 0x59f   : > { %2095 = vmatprep.subr.bf16.mxu0 %v2965_v62 }
 0x5a2   : > { %2096 = vmatpush1.bf16.msra.mxu0 %v2963_v0 }
 0x5a3   : > { %2097 = vmatprep.subr.bf16.mxu0 %v2971_v2 }
 0x5a6   : > { %2098 = vmatpush1.bf16.msra.mxu0 %v2969_v4 }
 0x5a7   : > { %2779 = vmatprep.subr.bf16.mxu0 %v3124_v38 }
 0x65c   : > { %v1641_v8 = vpop.f32.mrb[12].mxu0 }
 0x65d   : > { %v1642_v9 = vadd.f32 %v2512_v7, %v1641_v8  ;;  %v2777_v10 = vpop.f32.mrb[13].mxu0 }
 0x65e   : > { %v1644_v11 = vpop.f32.mrb[14].mxu0 }
 0x65f   : > { %v1645_v12 = vadd.f32 %v2512_v7, %v1644_v11  ;;  %v2778_v13 = vpop.f32.mrb[15].mxu0  ;;  %v1648_v14 = vmax.f32 %v1642_v9, 0.0 }
 0x661   : > { %v1649_v15 = vmax.f32 %v1645_v12, 0.0 }
 0x663   : > { %v1650_v18 = vpack.c.bf16 %v1649_v15, %v1648_v14 }
 0x665   : > { %2073 = vmatmul.mubr.bf16.vlgmr.msra.gmra.mrb[24].mxu1 %v1650_v18  ;;  %2116 = vmatmul.mubr.bf16.vlgmr.msra.gmra.mrb[16].mxu0 %v1650_v18 }
 0x666   : > { %2127 = vmatpush1.bf16.msra.mxu1 %v2972_v16  ;;  %2780 = vmatpush3.bf16.msra.mxu0 %v2975_v17 }
 0x667   : > { %2128 = vmatprep.subr.bf16.mxu1 %v2978_v19  ;;  %2781 = vmatprep.subr.bf16.mxu0 %v3124_v38 }
 0x668   : > { %2158 = vmatprep.mubr.bf16.mxu1 %v3126_v6  ;;  %2795 = vmatprep.mubr.msk.bf16.mxu0 %vm3125_vm0, %v3124_v38 }
 0x66a   : > { %2129 = vmatpush1.bf16.msra.mxu1 %v2976_v20  ;;  %2782 = vmatpush3.bf16.msra.mxu0 %v2979_v21 }
 0x66b   : > { %2130 = vmatprep.subr.bf16.mxu1 %v2982_v22  ;;  %2783 = vmatprep.subr.bf16.mxu0 %v3124_v38 }
 0x66e   : > { %2131 = vmatpush1.bf16.msra.mxu1 %v2980_v23  ;;  %2784 = vmatpush3.bf16.msra.mxu0 %v2983_v24 }
 0x66f   : > { %2132 = vmatprep.subr.bf16.mxu1 %v2986_v25  ;;  %2785 = vmatprep.subr.bf16.mxu0 %v3124_v38 }
 0x672   : > { %2133 = vmatpush1.bf16.msra.mxu1 %v2984_v26  ;;  %2786 = vmatpush3.bf16.msra.mxu0 %v2987_v27  ;;  %v1735_v27 = vsub.s32 4, %v3724_v42 }
 0x673   : > { %2134 = vmatprep.subr.bf16.mxu1 %v2990_v28  ;;  %2787 = vmatprep.subr.bf16.mxu0 %v3124_v38  ;;  %v1743_v28 = vsub.s32 6, %v3724_v42 }
 0x676   : > { %2135 = vmatpush1.bf16.msra.mxu1 %v2988_v29  ;;  %2788 = vmatpush3.bf16.msra.mxu0 %v2991_v30  ;;  %v1739_v29 = vsub.s32 5, %v3724_v42 }
 0x677   : > { %2136 = vmatprep.subr.bf16.mxu1 %v2994_v31  ;;  %2789 = vmatprep.subr.bf16.mxu0 %v3124_v38 }
 0x67a   : > { %2137 = vmatpush1.bf16.msra.mxu1 %v2992_v32  ;;  %2790 = vmatpush3.bf16.msra.mxu0 %v2995_v33  ;;  %v1736_v32 = vrot.slane %v3731_v45, %v1735_v27  ;;  %v1744_v33 = vrot.slane %v3731_v45, %v1743_v28 }
 0x67b   : > { %2138 = vmatprep.subr.bf16.mxu1 %v2998_v34  ;;  %2791 = vmatprep.subr.bf16.mxu0 %v3124_v38 }
 0x67e   : > { %2139 = vmatpush1.bf16.msra.mxu1 %v2996_v35  ;;  %2792 = vmatpush3.bf16.msra.mxu0 %v2999_v36  ;;  %v1740_v35 = vrot.slane %v3731_v45, %v1739_v29 }
 0x67f   : > { %2140 = vmatprep.subr.bf16.mxu1 %v3002_v37  ;;  %2793 = vmatprep.subr.bf16.mxu0 %v3124_v38  ;;  %v1731_v38 = vsub.s32 3, %v3724_v42 }
 0x681   : > { %v1732_v50 = vrot.slane %v3731_v45, %v1731_v38 }
 0x682   : > { %2141 = vmatpush1.bf16.msra.mxu1 %v3000_v39  ;;  %2794 = vmatpush3.bf16.msra.mxu0 %v3003_v40 }
 0x685   : > { %2159 = vmatmul.mubr.bf16.vlgmr.msra.gmra.mrb[28].mxu1 %v1650_v18  ;;  %2796 = vmatmul.mubr.bf16.vlgmr.msra.gmra.mrb[20].mxu0 %v1650_v18 }
 0x738   : > { %v2074_v51 = vpop.f32.mrb[24].mxu1  ;;  %v2117_v52 = vpop.f32.mrb[16].mxu0 }
 0x739   : > { %v2075_v53 = vadd.f32 %v2074_v51, %v1720_v47  ;;  %v2118_v54 = vadd.f32 %v2117_v52, %v1728_v48  ;;  %v2076_v55 = vpop.f32.mrb[25].mxu1  ;;  %v2119_v56 = vpop.f32.mrb[17].mxu0 }
 0x73a   : > { %v2077_v57 = vadd.f32 %v2076_v55, %v1724_v49  ;;  %v2120_v58 = vadd.f32 %v2119_v56, %v1732_v50  ;;  %v2078_v59 = vpop.f32.mrb[26].mxu1  ;;  %v2121_v60 = vpop.f32.mrb[18].mxu0 }
 0x73b   : > { %v2574_v61 = vmul.f32 -1.442695, %v2075_v53  ;;  %v2576_v62 = vmul.f32 -1.442695, %v2118_v54  ;;  %v2079_v63 = vadd.f32 %v2078_v59, %v1720_v47  ;;  %v2122_v0 = vadd.f32 %v2121_v60, %v1728_v48  ;;  %v2080_v1 = vpop.f32.mrb[27].mxu1  ;;  %v2123_v2 = vpop.f32.mrb[19].mxu0 }
 0x73c   : > { %v2575_v3 = vmul.f32 -1.442695, %v2077_v57  ;;  %v2577_v4 = vmul.f32 -1.442695, %v2120_v58  ;;  %v2081_v5 = vadd.f32 %v2080_v1, %v1724_v49  ;;  %v2124_v6 = vadd.f32 %v2123_v2, %v1732_v50 }
 0x73d   : > { %3004 = vpow2.f32 %v2574_v61  ;;  %v2581_v7 = vmul.f32 -1.442695, %v2079_v63  ;;  %v2583_v8 = vmul.f32 -1.442695, %v2122_v0 }
 0x73e   : > { %3006 = vpow2.f32 %v2576_v62  ;;  %v2582_v9 = vmul.f32 -1.442695, %v2081_v5  ;;  %v2584_v10 = vmul.f32 -1.442695, %v2124_v6 }
 0x73f   : > { %3008 = vpow2.f32 %v2575_v3 }
 0x740   : > { %3010 = vpow2.f32 %v2577_v4 }
 0x741   : > { %3012 = vpow2.f32 %v2581_v7 }
 0x742   : > { %3014 = vpow2.f32 %v2583_v8 }
 0x743   : > { %3016 = vpow2.f32 %v2582_v9 }
 0x744   : > { %3018 = vpow2.f32 %v2584_v10 }
 0x747   : > { %v3005_v11 = vpop.eup %3004 }
 0x748   : > { %v3007_v12 = vpop.eup %3006  ;;  %v2252_v13 = vadd.f32 1.0, %v3005_v11 }
 0x749   : > { %v3009_v14 = vpop.eup %3008  ;;  %v2254_v15 = vadd.f32 1.0, %v3007_v12 }
 0x74a   : > { %v3011_v16 = vpop.eup %3010  ;;  %3020 = vrcp.f32 %v2252_v13  ;;  %v2253_v17 = vadd.f32 1.0, %v3009_v14 }
 0x74b   : > { %v3013_v18 = vpop.eup %3012  ;;  %3022 = vrcp.f32 %v2254_v15  ;;  %v2255_v19 = vadd.f32 1.0, %v3011_v16 }
 0x74c   : > { %v3015_v20 = vpop.eup %3014  ;;  %3024 = vrcp.f32 %v2253_v17  ;;  %v2259_v21 = vadd.f32 1.0, %v3013_v18 }
 0x74d   : > { %v3017_v22 = vpop.eup %3016  ;;  %3026 = vrcp.f32 %v2255_v19  ;;  %v2261_v23 = vadd.f32 1.0, %v3015_v20 }
 0x74e   : > { %v3019_v24 = vpop.eup %3018  ;;  %3028 = vrcp.f32 %v2259_v21  ;;  %v2260_v25 = vadd.f32 1.0, %v3017_v22 }
 0x74f   : > { %3030 = vrcp.f32 %v2261_v23  ;;  %v2262_v26 = vadd.f32 1.0, %v3019_v24 }
 0x750   : > { %3032 = vrcp.f32 %v2260_v25 }
 0x751   : > { %3034 = vrcp.f32 %v2262_v26 }
 0x754   : > { %v3021_v30 = vpop.eup %3020 }
 0x755   : > { %v3023_v31 = vpop.eup %3022 }
 0x756   : > { %v3025_v34 = vpop.eup %3024 }
 0x757   : > { %v3027_v36 = vpop.eup %3026  ;;  %v2601_v37 = vpack.c.bf16 %v3025_v34, %v3021_v30 }
 0x758   : > { %v3029_v39 = vpop.eup %3028  ;;  %v2602_v40 = vpack.c.bf16 %v3027_v36, %v3023_v31  ;;  %v2160_v41 = vpop.f32.mrb[28].mxu1 }
 0x759   : > { %v2203_v43 = vpop.f32.mrb[20].mxu0  ;;  %v3031_v44 = vpop.eup %3030  ;;  %2338 = vst [vmem:[%s3748_s21] sm:$0xff] %v2601_v37  ;;  %v2161_v42 = vadd.f32 %v2160_v41, %v1736_v32 }
 0x75a   : > { %v2204_v46 = vadd.f32 %v2203_v43, %v1744_v33  ;;  %v2162_v38 = vpop.f32.mrb[29].mxu1  ;;  %v2797_v47 = vpop.f32.mrb[21].mxu0  ;;  %2339 = vst [vmem:[%s3748_s21 + $0x8] sm:$0xff] %v2602_v40 }
 0x75b   : > { %v3033_v48 = vpop.eup %3032  ;;  %v2163_v45 = vadd.f32 %v2162_v38, %v1740_v35  ;;  %v2164_v49 = vpop.f32.mrb[30].mxu1  ;;  %v2578_v53 = vmul.f32 -1.442695, %v2161_v42 }
 0x75c   : > { %v2206_v50 = vpop.f32.mrb[22].mxu0  ;;  %v3035_v51 = vpop.eup %3034  ;;  %v2605_v52 = vpack.c.bf16 %v3033_v48, %v3029_v39  ;;  %v2580_v54 = vmul.f32 -1.442695, %v2204_v46  ;;  %v2165_v55 = vadd.f32 %v2164_v49, %v1736_v32 }
 0x75d   : > { %v2166_v56 = vpop.f32.mrb[31].mxu1  ;;  %v2798_v57 = vpop.f32.mrb[23].mxu0  ;;  %v2606_v58 = vpack.c.bf16 %v3035_v51, %v3031_v44  ;;  %v2579_v59 = vmul.f32 -1.442695, %v2163_v45  ;;  %v2207_v60 = vadd.f32 %v2206_v50, %v1744_v33  ;;  %3036 = vpow2.f32 %v2578_v53 }
 0x75e   : > { %v2167_v61 = vadd.f32 %v2166_v56, %v1740_v35  ;;  %2343 = vst [vmem:[%s3748_s21 + $0x1c] sm:$0xff] %v2605_v52  ;;  %v2585_v62 = vmul.f32 -1.442695, %v2165_v55  ;;  %3038 = vpow2.f32 %v2580_v54 }
 0x75f   : > { %2344 = vst [vmem:[%s3748_s21 + $0x24] sm:$0xff] %v2606_v58  ;;  %v2587_v63 = vmul.f32 -1.442695, %v2207_v60  ;;  %3040 = vpow2.f32 %v2579_v59 }
 0x760   : > { %v2586_v0 = vmul.f32 -1.442695, %v2167_v61  ;;  %3042 = vpow2.f32 %v2585_v62 }
 0x761   : > { %3044 = vpow2.f32 %v2587_v63 }
 0x762   : > { %3046 = vpow2.f32 %v2586_v0 }
 0x767   : > { %v3037_v1 = vpop.eup %3036 }
 0x768   : > { %v3039_v2 = vpop.eup %3038  ;;  %v2256_v3 = vadd.f32 1.0, %v3037_v1 }
 0x769   : > { %v3041_v4 = vpop.eup %3040  ;;  %v2258_v5 = vadd.f32 1.0, %v3039_v2 }
 0x76a   : > { %v3043_v6 = vpop.eup %3042  ;;  %3048 = vrcp.f32 %v2256_v3  ;;  %v2257_v7 = vadd.f32 1.0, %v3041_v4 }
 0x76b   : > { %v3045_v8 = vpop.eup %3044  ;;  %3050 = vrcp.f32 %v2258_v5  ;;  %v2263_v9 = vadd.f32 1.0, %v3043_v6 }
 0x76c   : > { %v3047_v10 = vpop.eup %3046  ;;  %3052 = vrcp.f32 %v2257_v7  ;;  %v2265_v11 = vadd.f32 1.0, %v3045_v8 }
 0x76d   : > { %3054 = vrcp.f32 %v2263_v9  ;;  %v2264_v12 = vadd.f32 1.0, %v3047_v10 }
 0x76e   : > { %3056 = vrcp.f32 %v2265_v11 }
 0x76f   : > { %3058 = vrcp.f32 %v2264_v12 }
 0x774   : > { %v3049_v13 = vpop.eup %3048 }
 0x775   : > { %v3051_v14 = vpop.eup %3050 }
 0x776   : > { %v3053_v15 = vpop.eup %3052  ;;  %v2604_v16 = vpack.c.bf16 %v3051_v14, %v3051_v14 }
 0x777   : > { %v3055_v17 = vpop.eup %3054  ;;  %v2603_v18 = vpack.c.bf16 %v3053_v15, %v3049_v13 }
 0x778   : > { %v3057_v19 = vpop.eup %3056  ;;  %2342 = vst.msk [vmem:[%s3748_s21 + $0x18] sm:$0xf] %vm2341_vm7, %v2604_v16 }
 0x779   : > { %v3059_v20 = vpop.eup %3058  ;;  %2340 = vst [vmem:[%s3748_s21 + $0x10] sm:$0xff] %v2603_v18  ;;  %v2608_v21 = vpack.c.bf16 %v3057_v19, %v3057_v19 }
 0x77a   : > { %v2607_v22 = vpack.c.bf16 %v3059_v20, %v3055_v17 }
 0x77b   : > { %2346 = vst.msk [vmem:[%s3748_s21 + $0x34] sm:$0xf] %vm2341_vm7, %v2608_v21 }
 0x77c   : > { %2345 = vst [vmem:[%s3748_s21 + $0x2c] sm:$0xff] %v2607_v22 }
 0x77d   : > { %3073 = shalt.err (!%p3070_p3)
}
 0x77e   : > { %s3074_s29 = scalar_lea.hbm %s3761_s26, 896  ;;  %s3078_s18 = scalar_lea.hbm %s3849_s19, 1792 }
 0x77f   : > { %p3075_p4 = scmp.ne.s32.totalorder %s3761_s26, %s3074_s29  ;;  %p3079_p9 = scmp.lt.u32.totalorder %s3761_s26, %s3849_s19 }
 0x780   : > { %p3080_p10 = scmp.lt.u32.totalorder %s3078_s18, %s3074_s29  ;;  %p3082_p12 = scmp.lt.u32.totalorder %s3074_s29, %s3761_s26 }
 0x781   : > { %p3076_p7 = pnand %p3075_p4, %p3258_p5 }
 0x782   : > { %p3081_p11 = por %p3080_p10, %p3079_p9 }
 0x783   : > { %p3077_p8 = pneg %p3076_p7 }
 0x784   : > { %p3083_p13 = por %p3082_p12, %p3081_p11 }
 0x786   : > { %p3084_p0 = pnand %p3083_p13, %p3077_p8 }
 0x788   : > { %3087 = shalt.err (!%p3084_p0)
}
 0x789   : > { %s3128_s0 = smov 448   ;;  %s3129_s17 = smov 28  }
 0x78a   : > { %2802 = dma.vmem_to_hbm [thread:$0]  (%p3258_p5), %s3763_s20, 896, %s3761_s26, %s3769_s28, %s3128_s0, %s3128_s0, %s3129_s17  }
 0x78b PF: > { %s3850_s30 = sld [smem:[#allocation7_spill]]  ;;  %s3851_s21 = sld [smem:[#allocation5_spill]] }
 0x791   : > { %p2808_p1 = scmp.ge.s32.totalorder %s3850_s30, 2  ;;  %s2377_s27 = sand.u32 1, %s3851_s21  }
 0x792   : > { %s2378_s29 = scalar_lea.sflag [#allocation3], %s2377_s27 }
 0x793   : > { %p2805_p2 = pnand %p2808_p1, %p3262_p6 }
 0x795   : > { %3105 = dma.done.wait (!%p2805_p2), %s2378_s29, 896  }
 0x796   : > { %3107 = vsyncadd (!%p2805_p2), %s2378_s29, 4294966400  ;;  %s3853_s27 = sld [smem:[#allocation8_spill]]  ;;  %s3854_s18 = sld [smem:[#allocation6_spill]] }
 0x797   : > { %s3855_s26 = sld [smem:[#allocation9_spill]]  ;;  %s3856_s24 = smov %s3114_s25 }
 0x79c   : > { %p27_p3 = scmp.ge.s32.totalorder %s3853_s27, 4   ;;  %s3857_s25 = smov %s3854_s18 }
 0x79e   :  { %29 = sbr.rel (!%p27_p3) target bundleno = 7 (0x7), region = 123 }
 0x7a5   :  { %2383 = vsyncpa [#allocation3], 1 }
 0x7a6   :  { %2385 = vsyncpa [#allocation3 + $0x1], 1 }

</bundles_post_ra>
